<compile_context>
chip_gen: v5e
topology: v5e:2x2
jax: 0.10.0
libtpu: 0.0.40
codegen_flags: <defaults>
</compile_context>

<pallas_src>
import jax
import jax.numpy as jnp
from jax.experimental import pallas as pl
from jax.experimental.pallas import tpu as pltpu


# ----------------------------- kernels ------------------------------------


def _ntk_matmul_kernel(x_ref, w_ref, o_ref):
    """Fast path: full-K x tile and fully VMEM-resident weight -> one MXU dot."""
    o_ref[...] = jnp.dot(
        x_ref[...], w_ref[...], preferred_element_type=jnp.float32
    ).astype(o_ref.dtype)


def _ntk_matmul_reduce_kernel(x_ref, w_ref, o_ref, acc_ref):
    """Fallback path for very large K: tiled K reduction with f32 accumulator."""
    k = pl.program_id(1)

    @pl.when(k == 0)
    def _():
        acc_ref[...] = jnp.zeros_like(acc_ref)

    acc_ref[...] += jnp.dot(
        x_ref[...], w_ref[...], preferred_element_type=jnp.float32
    )

    @pl.when(k == pl.num_programs(1) - 1)
    def _():
        o_ref[...] = acc_ref[...].astype(o_ref.dtype)


# --------------------------- sizing helpers --------------------------------


def _round_up(a, b):
    return -(-a // b) * b


def _tiled_bytes(rows, cols, itemsize):
    """VMEM footprint of a (rows, cols) buffer under (8,128) tiling.

    Lanes round up to 128; sublanes round to 8 (sub-32-bit dtypes pack along
    sublanes, so their sublane quantum is 8 * (4 // itemsize))."""
    sublane = 8 * max(1, 4 // itemsize)
    return _round_up(max(rows, 1), sublane) * _round_up(max(cols, 1), 128) * itemsize


def _fast_path_bytes(tm, K, Np, x_it, w_it, o_it):
    return (
        2 * _tiled_bytes(tm, K, x_it)     # x row block, double-buffered
        + 1 * _tiled_bytes(K, Np, w_it)   # weight, constant index -> Buffered(1)
        + 2 * _tiled_bytes(tm, Np, o_it)  # output block, double-buffered
    )


def _fallback_bytes(tm, tk, Np, x_it, w_it, o_it):
    return (
        3 * _tiled_bytes(tm, tk, x_it)    # x stream, Buffered(3)
        + 2 * _tiled_bytes(tk, Np, w_it)  # weight K-slices, double-buffered
        + 2 * _tiled_bytes(tm, Np, o_it)  # output block
        + _tiled_bytes(tm, Np, 4)         # f32 accumulator scratch
    )


def _vmem_budget_and_limit():
    """Generation-aware (budget_for_tiling, vmem_limit_bytes)."""
    phys = None
    try:
        info = pltpu.get_tpu_info()
        phys = getattr(info, "vmem_capacity_bytes", None)
    except Exception:
        phys = None
    if not phys:
        # Conservative fallback: v7x has the smallest VMEM (64 MiB per TC).
        phys = 64 * 1024 * 1024
    budget = int(phys * 0.70)   # headroom for Mosaic internal scratch / sems
    limit = int(phys * 0.85)
    return budget, limit


def _block_spec(shape, index_map, buffers=None):
    """BlockSpec with optional pipeline_mode, falling back if unsupported."""
    if buffers is not None:
        try:
            return pl.BlockSpec(shape, index_map, pipeline_mode=pl.Buffered(buffers))
        except (TypeError, AttributeError):
            pass
    return pl.BlockSpec(shape, index_map)


# ------------------------------ wrapper -------------------------------------


def ntk_classify_forward(
    x,
    weight,
    *,
    min_bytes_for_pallas=256 * 1024,   # below this, plain XLA dot wins
    vmem_budget_bytes=None,            # override (testing / tuning)
    cast_to_bf16=False,                # optional ~2x HBM saving if accuracy allows
):
    """Pallas implementation of NTK_classify.forward: x @ weight."""
    M, K = x.shape
    K2, N = weight.shape
    assert K == K2, "inner dims must match"
    out_dtype = x.dtype

    # ---- tiny-shape escape hatch: launch overhead dominates below this ----
    operand_bytes = x.size * x.dtype.itemsize + weight.size * weight.dtype.itemsize
    if min_bytes_for_pallas and operand_bytes < min_bytes_for_pallas:
        return jnp.dot(x, weight).astype(out_dtype)

    if cast_to_bf16:
        x = x.astype(jnp.bfloat16)
        weight = weight.astype(jnp.bfloat16)

    # ---- lane-dense output: pad classes dim to a multiple of 128 ----------
    # Weight is copied once in HBM (K * (Np-N) * itemsize, negligible vs. x
    # traffic); output is sliced back below.  VMEM footprint is unchanged
    # (lanes pad to 128 anyway) and stores become full-width vst.
    Np = _round_up(N, 128)
    wp = jnp.pad(weight, ((0, 0), (0, Np - N))) if Np != N else weight

    auto_budget, vmem_limit = _vmem_budget_and_limit()
    budget = vmem_budget_bytes if vmem_budget_bytes is not None else auto_budget

    x_it = x.dtype.itemsize
    w_it = wp.dtype.itemsize
    o_it = jnp.dtype(out_dtype).itemsize

    # ---- choose the M tile.  >= 2 blocks for 16 < M so both v7x TCs work. --
    if M <= 16:
        tm_cands = [M]  # full-extent block, no 8-divisibility needed
    else:
        half = _round_up(-(-M // 2), 8)
        tm_cands = sorted(
            {min(half, t) for t in (1024, 512, 256, 128, 64, 32, 16, 8)},
            reverse=True,
        )

    tm_fast = None
    for t in tm_cands:
        if _fast_path_bytes(t, K, Np, x_it, w_it, o_it) <= budget:
            tm_fast = t
            break

    compiler_params_fast = pltpu.CompilerParams(
        # TODO(synk): try pltpu.CORE_PARALLEL on the M axis for v7x.
        dimension_semantics=("parallel",),
        vmem_limit_bytes=vmem_limit,
    )

    if tm_fast is not None:
        # ---------------- fast path: collapsed K, resident weight ----------
        grid_m = -(-M // tm_fast)  # ragged trailing block handled by masking
        out = pl.pallas_call(
            _ntk_matmul_kernel,
            out_shape=jax.ShapeDtypeStruct((M, Np), out_dtype),
            grid_spec=pltpu.PrefetchScalarGridSpec(
                num_scalar_prefetch=0,
                grid=(grid_m,),
                in_specs=[
                    # x: one (tm, full-K) row block per grid step.
                    pl.BlockSpec((tm_fast, K), lambda i: (i, 0)),
                    # weight: full array, constant block index -> DMA'd once;
                    # single-buffered since the block never changes.
                    _block_spec((K, Np), lambda i: (0, 0), buffers=1),
                ],
                out_specs=pl.BlockSpec((tm_fast, Np), lambda i: (i, 0)),
            ),
            compiler_params=compiler_params_fast,
        )(x, wp)
    else:
        # -------- fallback: very large dim_rep -> tiled-K reduction --------
        tm_fb = M if M <= 16 else min(256, _round_up(-(-M // 2), 8))
        k_cap = _round_up(K, 128)
        tk = None
        for t in sorted(
            {min(t, k_cap) for t in (8192, 4096, 2048, 1024, 512, 256, 128)},
            reverse=True,
        ):
            if _fallback_bytes(tm_fb, t, Np, x_it, w_it, o_it) <= budget:
                tk = t
                break
        if tk is None:
            tk = 128  # last resort; vmem_limit_bytes keeps the compiler honest

        # Zero-pad K (reduction correctness); M stays ragged-masked.
        k_pad = (-K) % tk
        xk = jnp.pad(x, ((0, 0), (0, k_pad))) if k_pad else x
        wk = jnp.pad(wp, ((0, k_pad), (0, 0))) if k_pad else wp
        Kp = K + k_pad
        grid_m = -(-M // tm_fb)

        out = pl.pallas_call(
            _ntk_matmul_reduce_kernel,
            out_shape=jax.ShapeDtypeStruct((M, Np), out_dtype),
            grid_spec=pltpu.PrefetchScalarGridSpec(
                num_scalar_prefetch=0,
                grid=(grid_m, Kp // tk),
                in_specs=[
                    _block_spec((tm_fb, tk), lambda i, k: (i, k), buffers=3),
                    pl.BlockSpec((tk, Np), lambda i, k: (k, 0)),
                ],
                out_specs=pl.BlockSpec((tm_fb, Np), lambda i, k: (i, 0)),
                scratch_shapes=[pltpu.VMEM((tm_fb, Np), jnp.float32)],
            ),
            compiler_params=pltpu.CompilerParams(
                dimension_semantics=("parallel", "arbitrary"),
                vmem_limit_bytes=vmem_limit,
            ),
        )(xk, wk)

    return out[:, :N] if Np != N else out


# -------------------------------- test --------------------------------------


if __name__ == "__main__":
    key = jax.random.PRNGKey(0)
    kx, kw = jax.random.split(key)

    # Small shapes consistent with the module: dim_rep is the (large) NTK
    # representation dim, classes=10.  batch=24 gives two M blocks (one
    # ragged) so megacore splitting and masked trailing blocks are exercised.
    batch, dim_rep, classes = 24, 1024, 10
    x = jax.random.normal(kx, (batch, dim_rep), dtype=jnp.float32)
    # Module __init__ zero-inits the weight; use deterministic random values
    # instead so the matmul is actually exercised (same shape/dtype).
    weight = jax.random.normal(kw, (dim_rep, classes), dtype=jnp.float32) * 0.01
    ref = x @ weight

    # 1) Fast path (collapsed K, VMEM-resident weight), forced past the
    #    tiny-shape escape hatch.
    out_fast = jax.block_until_ready(
        ntk_classify_forward(x, weight, min_bytes_for_pallas=0)
    )
    assert out_fast.shape == (batch, classes)
    assert jnp.allclose(out_fast, ref, atol=1e-4, rtol=1e-4)

    # 2) K-tiled fallback path, forced via an artificially small tile budget
    #    (vmem_limit_bytes stays at the real hardware value).
    out_fb = jax.block_until_ready(
        ntk_classify_forward(
            x, weight, min_bytes_for_pallas=0, vmem_budget_bytes=1 << 19
        )
    )
    assert out_fb.shape == (batch, classes)
    assert jnp.allclose(out_fb, ref, atol=1e-4, rtol=1e-4)

    # 3) Default behavior: tiny operands take the plain-XLA escape hatch.
    out_def = jax.block_until_ready(ntk_classify_forward(x, weight))
    assert jnp.allclose(out_def, ref, atol=1e-4, rtol=1e-4)

    print("KERNEL_OK")
</pallas_src>

<mosaic_0001>
module attributes {stable_mosaic.version = 11 : i64} {
  func.func @_ntk_matmul_kernel(%arg0: i32, %arg1: memref<16x1024xf32, #tpu.memory_space<vmem>>, %arg2: memref<1024x128xf32, #tpu.memory_space<vmem>>, %arg3: memref<16x128xf32, #tpu.memory_space<vmem>>) attributes {dimension_semantics = [#tpu.dimension_semantics<parallel>], iteration_bounds = array<i64: 2>, scalar_prefetch = 0 : i64, scratch_operands = 0 : i64, tpu.core_type = #tpu.core_type<tc>, window_params = [{transform_indices = @transform_0, window_bounds = array<i64: 16, 1024>}, {pipeline_mode = #tpu.pipeline_mode<synchronous>, transform_indices = @transform_1, window_bounds = array<i64: 1024, 128>}, {transform_indices = @transform_2, window_bounds = array<i64: 16, 128>}]} {
    %c0 = arith.constant 0 : index
    %c0_0 = arith.constant 0 : index
    %0 = vector.load %arg1[%c0, %c0_0] : memref<16x1024xf32, #tpu.memory_space<vmem>>, vector<16x1024xf32>
    %c0_1 = arith.constant 0 : index
    %c0_2 = arith.constant 0 : index
    %1 = vector.load %arg2[%c0_1, %c0_2] : memref<1024x128xf32, #tpu.memory_space<vmem>>, vector<1024x128xf32>
    %cst = arith.constant dense<0.000000e+00> : vector<16x128xf32>
    %2 = tpu.matmul %0, %1, %cst {dimension_numbers = #tpu.dot_dimension_numbers<[1], [0], [0], [1], [0, 0, 1, 1], [], []>} : vector<16x1024xf32>, vector<1024x128xf32>, vector<16x128xf32> -> vector<16x128xf32>
    %c0_3 = arith.constant 0 : index
    %c0_4 = arith.constant 0 : index
    %3 = vector.load %arg3[%c0_3, %c0_4] : memref<16x128xf32, #tpu.memory_space<vmem>>, vector<16x128xf32>
    tpu.vector_store %arg3[%c0_3, %c0_4], %2 {strides = array<i32>} : memref<16x128xf32, #tpu.memory_space<vmem>>, vector<16x128xf32>,
    return
  }
  func.func @transform_0(%arg0: i32) -> (i32, i32) {
    %c0_i32 = arith.constant 0 : i32
    %c0_i32_0 = arith.constant 0 : i32
    return %arg0, %c0_i32 : i32, i32
  }
  func.func @transform_1(%arg0: i32) -> (i32, i32) {
    %c0_i32 = arith.constant 0 : i32
    %c0_i32_0 = arith.constant 0 : i32
    %c0_i32_1 = arith.constant 0 : i32
    return %c0_i32, %c0_i32_0 : i32, i32
  }
  func.func @transform_2(%arg0: i32) -> (i32, i32) {
    %c0_i32 = arith.constant 0 : i32
    %c0_i32_0 = arith.constant 0 : i32
    return %arg0, %c0_i32 : i32, i32
  }
}

</mosaic_0001>

<bundles_post_ra>
// kernel: tpu_custom_call.1
= control target key start
LH: loop header
LB: loop body
LE: loop exit
PB: predicated region body
PF: predicated region fallthrough
CT: control target
= control target key end

     0   :  { %7 = vsyncpa [#allocation3], 0  ;;  %s1116_s0 = inlined_call_operand.hbm [shape: f32[24,1024], index: 0, kind: input, shape index: {}]   ;;  %s1117_s1 = inlined_call_operand.hbm [shape: f32[1024,128], index: 1, kind: input, shape index: {}]   ;;  %s1118_s2 = inlined_call_operand.hbm [shape: f32[24,128], index: 2, kind: output, shape index: {}]  }
   0x1   :  { %9 = vsyncpa [#allocation3 + $0x1], 0 }
   0x2   :  { %10 = vsyncpa [#allocation6], 0 }
   0x3   :  { %11 = vsyncpa [#allocation4], 0 }
   0x4   :  { %13 = vsyncpa [#allocation4 + $0x1], 0  ;;  %s899_s9 = smov 0   ;;  %s901_s10 = smov 0  }
   0x5   :  { %s903_s11 = smov 0   ;;  %s905_s12 = smov 0  }
   0x6 LB: > { %s920_s13 = sadd.s32 4294967295, %s873_s12   ;;  %s637_s14 = sadd.s32 4294967294, %s873_s12   ;;  %s873_s12 = sphi %s905_s12, %s1135_s12   ;;  %s869_s11 = sphi %s903_s11, %s1134_s11   ;;  %s865_s10 = sphi %s901_s10, %s1133_s10   ;;  %s861_s9 = sphi %s899_s9, %s1132_s9  }
   0x7   : > { %s924_s15 = sadd.s32 1, %s873_s12   ;;  %s26_s16 = sadd.s32 1, %s869_s11 }
   0x8   : > { %s23_s17 = ssub.s32 %s873_s12, %s924_s15  ;;  %p33_p0 = scmp.ne.s32.totalorder %s869_s11, %s865_s10 }
   0x9   : > { %p24_p1 = scmp.eq.s32.totalorder %s23_s17, 0  ;;  %p34_p2 = scmp.eq.s32.totalorder %s873_s12, 0 }
   0xa   : > { %p39_p3 = scmp.ne.s32.totalorder %s865_s10, %s861_s9  ;;  %p1120_p4 = scmp.eq.s32.totalorder %s920_s13, 0 }
   0xb   : > { %s936_s18 = scalar_select %p24_p1, %s869_s11, %s26_s16  }
   0xc   : > { %p938_p5 = por %p34_p2, %p33_p0  ;;  %p944_p6 = por %p1120_p4, %p39_p3 }
   0xd   : > { %p84_p7 = scmp.eq.s32.totalorder %s920_s13, 1  ;;  %p90_p8 = scmp.eq.s32.totalorder %s637_s14, 1 }
   0xe   : > { %p638_p9 = scmp.ge.s32.totalorder %s873_s12, 1  ;;  %p97_p10 = scmp.lt.s32.totalorder %s873_s12, 3 }
   0xf   : > { %p951_p11 = por %p84_p7, %p33_p0  ;;  %p955_p12 = por %p90_p8, %p39_p3 }
  0x10   : > { %p959_p13 = pnand %p638_p9, %p97_p10  ;;  %s108_s26 = sshll.u32 %s1117_s1, 4  ;;  %s109_s26 = int_to_ptr.hbm [resolvable:$true] %s108_s26 }
  0x11   : > { %s1124_s22 = scalar_select %p955_p12, 1, 0 }
  0x12   : > { %p673_p1 = pneg %p959_p13  ;;  %s875_s27 = smov [#allocation5]  }
  0x13   : > { %s110_s28 = sshll.u32 %s875_s27, 4  ;;  %s876_s29 = smov 128   ;;  %s111_s28 = int_to_ptr.vmem [resolvable:$true] %s110_s28 }
  0x14   : > { %p674_p0 = pnand %p673_p1, %p1120_p4  ;;  %s877_s30 = smov 8  }
  0x15   : > { %p1119_p2 = scmp.ge.s32.totalorder %s873_s12, 2 }
  0x16   : > { %676 = dma.hbm_to_vmem [thread:$0]  (!%p674_p0), %s109_s26, 16384, %s111_s28, [#allocation6], %s876_s29, %s876_s29, %s877_s30  }
  0x17   : > { %120 = sbr.rel (%p1119_p2) target bundleno = 64 (0x40), region = 20 }
  0x1c   : > { %123 = sbr.rel (!%p938_p5) target bundleno = 64 (0x40), region = 24  ;;  %s124_s3 = sand.u32 (%p938_p5), 1, %s869_s11  }
  0x1d   : > { %s642_s4 = sshll.u32 (%p938_p5), %s873_s12, 1  ;;  %s641_s5 = sshll.u32 (%p938_p5), %s124_s3, 7 }
  0x1e   : > { %s130_s6 = ssub.s32 (%p938_p5), 3, %s642_s4  ;;  %s980_s16 = scalar_lea.sflag (%p938_p5), [#allocation3], %s124_s3 }
  0x1f   : > { %p131_p3 = scmp.lt.s32.totalorder (%p938_p5), %s130_s6, 2  ;;  %s128_s17 = scalar_lea.vmem (%p938_p5), [#allocation2], %s641_s5 }
  0x21   : > { %s1137_s6 = smov (!%p131_p3, %s130_s6), 2 }
  0x22   : > { %s663_s7 = sshll.u32 %s1137_s6, 6 }
  0x23   : > { %s135_s8 = ssub.s32 128, %s663_s7 }
  0x24   : > { %s136_s14 = sshll.u32 %s135_s8, 4 }
  0x25   : > { %137 = vsyncadd %s980_s16, %s136_s14  ;;  %p983_p5 = scmp.ne.s32.totalorder %s663_s7, 0  ;;  %s665_s24 = sshll.u32 %s873_s12, 7 }
  0x26   : > { %s141_s27 = scalar_lea.hbm %s1116_s0, %s665_s24  ;;  %s991_s28 = sshll.u32 %s128_s17, 4  ;;  %s146_s28 = int_to_ptr.vmem [resolvable:$true] %s991_s28 }
  0x27   : > { %s143_s29 = sshll.u32 %s141_s27, 4  ;;  %s649_s30 = sshll.u32 %s1137_s6, 10  ;;  %s994_s29 = int_to_ptr.hbm [resolvable:$true] %s143_s29 }
  0x28   : > { %s753_s3 = sshra.s32 %s994_s29, 4  ;;  %s755_s4 = sshrl.u32 %s649_s30, 4  ;;  %s754_s3 = int_to_ptr.hbm [resolvable:$true] %s753_s3 }
  0x29   : > { %s760_s5 = scalar_lea.hbm %s754_s3, %s755_s4  ;;  %s764_s14 = scalar_lea.hbm %s1116_s0, 192 }
  0x2a   : > { %p761_p7 = scmp.ne.s32.totalorder %s754_s3, %s760_s5  ;;  %p765_p10 = scmp.lt.s32.totalorder %s754_s3, %s1116_s0 }
  0x2b   : > { %p766_p1 = scmp.lt.s32.totalorder %s764_s14, %s760_s5 }
  0x2c   : > { %p762_p8 = pnand %p761_p7, %p983_p5 }
  0x2d   : > { %p767_p0 = por %p766_p1, %p765_p10 }
  0x2e   : > { %p763_p9 = pneg %p762_p8 }
  0x30   : > { %p768_p3 = pnand %p767_p0, %p763_p9 }
  0x32   : > { %771 = shalt.err (!%p768_p3)
}
  0x33   : > { %s772_s25 = sshra.s32 %s146_s28, 4  ;;  %s878_s27 = smov [#allocation2]   ;;  %s773_s25 = int_to_ptr.vmem [resolvable:$true] %s772_s25 }
  0x34   : > { %s779_s26 = scalar_lea.vmem %s773_s25, %s755_s4  ;;  %s783_s7 = scalar_lea.vmem %s878_s27, 256 }
  0x35   : > { %p780_p7 = scmp.ne.s32.totalorder %s773_s25, %s779_s26  ;;  %p785_p4 = scmp.lt.s32.totalorder %s783_s7, %s779_s26 }
  0x37   : > { %p781_p8 = pnand %p780_p7, %p983_p5 }
  0x39   : > { %p782_p2 = pneg %p781_p8 }
  0x3b   : > { %p787_p12 = pnand %p785_p4, %p782_p2 }
  0x3d   : > { %790 = shalt.err (!%p787_p12)
}
  0x3e   : > { %s879_s3 = smov 1024   ;;  %s880_s5 = smov 64  }
  0x3f   : > { %151 = dma.hbm_to_vmem [thread:$0]  (%p983_p5), %s994_s29, %s649_s30, %s146_s28, %s980_s16, %s879_s3, %s879_s3, %s880_s5  }
  0x40 PF: > { %157 = sbr.rel (%p959_p13) target bundleno = 318 (0x13e), region = 28  ;;  %s1023_s4 = sand.u32 (!%p959_p13), 1, %s865_s10  }
  0x41   : > { %s651_s8 = sshll.u32 (!%p959_p13), %s1023_s4, 7  ;;  %s160_s14 = scalar_lea.sflag (!%p959_p13), [#allocation3], %s1023_s4 }
  0x42   : > { %s1027_s17 = scalar_lea.vmem (!%p959_p13), [#allocation2], %s651_s8 }
  0x45   : > { %848 = dma.done.wait (%p944_p6), %s160_s14, 2048  }
  0x46   : > { %850 = vsyncadd (%p944_p6), %s160_s14, 4294965248  ;;  %p1127_p4 = scmp.eq.s32.totalorder %s920_s13, 0 }
  0x48   : > { %852 = dma.done.wait (%p1127_p4), [#allocation6], 16384   ;;  %p1128_p12 = pmov %p1127_p4 }
  0x49   : > { %v232_v0 = vld [vmem:[#allocation5 + $0x78] sm:$0xff]  ;;  %v231_v2 = vld [vmem:[#allocation5 + $0x70] sm:$0xff]  ;;  %v230_v6 = vld [vmem:[#allocation5 + $0x68] sm:$0xff]  ;;  %s653_s20 = sshll.u32 %s1023_s4, 4  ;;  %s532_s6 = scalar_lea.sflag [#allocation4], %s1023_s4 }
  0x4a   : > { %854 = vsyncadd (%p1128_p12), [#allocation6], 4294950912  ;;  %v264_v1 = vld [vmem:[#allocation5 + $0x178] sm:$0xff]  ;;  %345 = vmatpush.msra.mxu0 %v232_v0  ;;  %v263_v4 = vld [vmem:[#allocation5 + $0x170] sm:$0xff]  ;;  %s189_s23 = scalar_lea.vmem [#allocation7], %s653_s20  ;;  %s655_s16 = sshll.u32 (%p951_p11), %s920_s13, 1 }
  0x4b   : > { %391 = vmatpush.msra.mxu2 %v264_v1  ;;  %v248_v3 = vld [vmem:[#allocation5 + $0xf8] sm:$0xff]  ;;  %v247_v7 = vld [vmem:[#allocation5 + $0xf0] sm:$0xff]  ;;  %v262_v8 = vld [vmem:[#allocation5 + $0x168] sm:$0xff]  ;;  %s540_s19 = ssub.s32 (%p951_p11), 3, %s655_s16 }
  0x4c   : > { %v280_v5 = vld [vmem:[#allocation5 + $0x1f8] sm:$0xff]  ;;  %368 = vmatpush.msra.mxu1 %v248_v3  ;;  %346 = vmatpush.msra.mxu0 %v231_v2  ;;  %v279_v9 = vld [vmem:[#allocation5 + $0x1f0] sm:$0xff]  ;;  %v246_v10 = vld [vmem:[#allocation5 + $0xe8] sm:$0xff]  ;;  %p541_p6 = scmp.lt.s32.totalorder (%p951_p11), %s540_s19, 2 }
  0x4d   : > { %414 = vmatpush.msra.mxu3 %v280_v5  ;;  %392 = vmatpush.msra.mxu2 %v263_v4  ;;  %v229_v11 = vld [vmem:[#allocation5 + $0x60] sm:$0xff]  ;;  %v278_v13 = vld [vmem:[#allocation5 + $0x1e8] sm:$0xff]  ;;  %v228_v16 = vld [vmem:[#allocation5 + $0x58] sm:$0xff] }
  0x4e   : > { %369 = vmatpush.msra.mxu1 %v247_v7  ;;  %v261_v12 = vld [vmem:[#allocation5 + $0x160] sm:$0xff]  ;;  %347 = vmatpush.msra.mxu0 %v230_v6  ;;  %v260_v17 = vld [vmem:[#allocation5 + $0x158] sm:$0xff]  ;;  %v227_v20 = vld [vmem:[#allocation5 + $0x50] sm:$0xff] }
  0x4f   : > { %415 = vmatpush.msra.mxu3 %v279_v9  ;;  %393 = vmatpush.msra.mxu2 %v262_v8  ;;  %v245_v14 = vld [vmem:[#allocation5 + $0xe0] sm:$0xff]  ;;  %v244_v18 = vld [vmem:[#allocation5 + $0xd8] sm:$0xff]  ;;  %v259_v21 = vld [vmem:[#allocation5 + $0x150] sm:$0xff] }
  0x50   : > { %v277_v15 = vld [vmem:[#allocation5 + $0x1e0] sm:$0xff]  ;;  %370 = vmatpush.msra.mxu1 %v246_v10  ;;  %348 = vmatpush.msra.mxu0 %v229_v11  ;;  %v276_v19 = vld [vmem:[#allocation5 + $0x1d8] sm:$0xff]  ;;  %v243_v22 = vld [vmem:[#allocation5 + $0xd0] sm:$0xff] }
  0x51   : > { %416 = vmatpush.msra.mxu3 %v278_v13  ;;  %394 = vmatpush.msra.mxu2 %v261_v12  ;;  %v275_v23 = vld [vmem:[#allocation5 + $0x1d0] sm:$0xff]  ;;  %v226_v24 = vld [vmem:[#allocation5 + $0x48] sm:$0xff]  ;;  %v225_v28 = vld [vmem:[#allocation5 + $0x40] sm:$0xff] }
  0x52   : > { %371 = vmatpush.msra.mxu1 %v245_v14  ;;  %349 = vmatpush.msra.mxu0 %v228_v16  ;;  %v258_v25 = vld [vmem:[#allocation5 + $0x148] sm:$0xff]  ;;  %v257_v29 = vld [vmem:[#allocation5 + $0x140] sm:$0xff]  ;;  %v224_v32 = vld [vmem:[#allocation5 + $0x38] sm:$0xff] }
  0x53   : > { %417 = vmatpush.msra.mxu3 %v277_v15  ;;  %395 = vmatpush.msra.mxu2 %v260_v17  ;;  %v242_v26 = vld [vmem:[#allocation5 + $0xc8] sm:$0xff]  ;;  %v241_v30 = vld [vmem:[#allocation5 + $0xc0] sm:$0xff]  ;;  %v256_v33 = vld [vmem:[#allocation5 + $0x138] sm:$0xff] }
  0x54   : > { %372 = vmatpush.msra.mxu1 %v244_v18  ;;  %350 = vmatpush.msra.mxu0 %v227_v20  ;;  %v274_v27 = vld [vmem:[#allocation5 + $0x1c8] sm:$0xff]  ;;  %v273_v31 = vld [vmem:[#allocation5 + $0x1c0] sm:$0xff]  ;;  %v240_v34 = vld [vmem:[#allocation5 + $0xb8] sm:$0xff] }
  0x55   : > { %418 = vmatpush.msra.mxu3 %v276_v19  ;;  %396 = vmatpush.msra.mxu2 %v259_v21  ;;  %v272_v35 = vld [vmem:[#allocation5 + $0x1b8] sm:$0xff]  ;;  %v223_v36 = vld [vmem:[#allocation5 + $0x30] sm:$0xff]  ;;  %v222_v40 = vld [vmem:[#allocation5 + $0x28] sm:$0xff] }
  0x56   : > { %373 = vmatpush.msra.mxu1 %v243_v22  ;;  %351 = vmatpush.msra.mxu0 %v226_v24  ;;  %v255_v37 = vld [vmem:[#allocation5 + $0x130] sm:$0xff]  ;;  %v254_v41 = vld [vmem:[#allocation5 + $0x128] sm:$0xff]  ;;  %v221_v44 = vld [vmem:[#allocation5 + $0x20] sm:$0xff] }
  0x57   : > { %419 = vmatpush.msra.mxu3 %v275_v23  ;;  %397 = vmatpush.msra.mxu2 %v258_v25  ;;  %v239_v38 = vld [vmem:[#allocation5 + $0xb0] sm:$0xff]  ;;  %v238_v42 = vld [vmem:[#allocation5 + $0xa8] sm:$0xff]  ;;  %v253_v45 = vld [vmem:[#allocation5 + $0x120] sm:$0xff] }
  0x58   : > { %374 = vmatpush.msra.mxu1 %v242_v26  ;;  %352 = vmatpush.msra.mxu0 %v225_v28  ;;  %v271_v39 = vld [vmem:[#allocation5 + $0x1b0] sm:$0xff]  ;;  %v270_v43 = vld [vmem:[#allocation5 + $0x1a8] sm:$0xff]  ;;  %v237_v46 = vld [vmem:[#allocation5 + $0xa0] sm:$0xff] }
  0x59   : > { %420 = vmatpush.msra.mxu3 %v274_v27  ;;  %398 = vmatpush.msra.mxu2 %v257_v29  ;;  %v269_v47 = vld [vmem:[#allocation5 + $0x1a0] sm:$0xff]  ;;  %v220_v48 = vld [vmem:[#allocation5 + $0x18] sm:$0xff]  ;;  %v219_v52 = vld [vmem:[#allocation5 + $0x10] sm:$0xff] }
  0x5a   : > { %375 = vmatpush.msra.mxu1 %v241_v30  ;;  %353 = vmatpush.msra.mxu0 %v224_v32  ;;  %v252_v49 = vld [vmem:[#allocation5 + $0x118] sm:$0xff]  ;;  %v251_v53 = vld [vmem:[#allocation5 + $0x110] sm:$0xff]  ;;  %v218_v56 = vld [vmem:[#allocation5 + $0x8] sm:$0xff] }
  0x5b   : > { %421 = vmatpush.msra.mxu3 %v273_v31  ;;  %399 = vmatpush.msra.mxu2 %v256_v33  ;;  %v236_v50 = vld [vmem:[#allocation5 + $0x98] sm:$0xff]  ;;  %v235_v54 = vld [vmem:[#allocation5 + $0x90] sm:$0xff]  ;;  %v250_v57 = vld [vmem:[#allocation5 + $0x108] sm:$0xff] }
  0x5c   : > { %376 = vmatpush.msra.mxu1 %v240_v34  ;;  %354 = vmatpush.msra.mxu0 %v223_v36  ;;  %v268_v51 = vld [vmem:[#allocation5 + $0x198] sm:$0xff]  ;;  %v267_v55 = vld [vmem:[#allocation5 + $0x190] sm:$0xff]  ;;  %v234_v58 = vld [vmem:[#allocation5 + $0x88] sm:$0xff] }
  0x5d   : > { %422 = vmatpush.msra.mxu3 %v272_v35  ;;  %400 = vmatpush.msra.mxu2 %v255_v37  ;;  %v266_v59 = vld [vmem:[#allocation5 + $0x188] sm:$0xff]  ;;  %v217_v60 = vld [vmem:[#allocation5] sm:$0xff]  ;;  %v296_v62 = vld [vmem:[#allocation5 + $0x278] sm:$0xff] }
  0x5e   : > { %377 = vmatpush.msra.mxu1 %v239_v38  ;;  %355 = vmatpush.msra.mxu0 %v222_v40  ;;  %v249_v61 = vld [vmem:[#allocation5 + $0x100] sm:$0xff]  ;;  %v328_v63 = vld [vmem:[#allocation5 + $0x378] sm:$0xff]  ;;  %v295_v2 = vld [vmem:[#allocation5 + $0x270] sm:$0xff] }
  0x5f   : > { %423 = vmatpush.msra.mxu3 %v271_v39  ;;  %401 = vmatpush.msra.mxu2 %v254_v41  ;;  %v233_v0 = vld [vmem:[#allocation5 + $0x80] sm:$0xff]  ;;  %v312_v3 = vld [vmem:[#allocation5 + $0x2f8] sm:$0xff]  ;;  %v327_v4 = vld [vmem:[#allocation5 + $0x370] sm:$0xff] }
  0x60   : > { %378 = vmatpush.msra.mxu1 %v238_v42  ;;  %356 = vmatpush.msra.mxu0 %v221_v44  ;;  %v265_v1 = vld [vmem:[#allocation5 + $0x180] sm:$0xff]  ;;  %v344_v5 = vld [vmem:[#allocation5 + $0x3f8] sm:$0xff]  ;;  %v294_v6 = vld [vmem:[#allocation5 + $0x268] sm:$0xff] }
  0x61   : > { %424 = vmatpush.msra.mxu3 %v270_v43  ;;  %402 = vmatpush.msra.mxu2 %v253_v45  ;;  %v311_v7 = vld [vmem:[#allocation5 + $0x2f0] sm:$0xff]  ;;  %v326_v8 = vld [vmem:[#allocation5 + $0x368] sm:$0xff]  ;;  %v293_v10 = vld [vmem:[#allocation5 + $0x260] sm:$0xff] }
  0x62   : > { %379 = vmatpush.msra.mxu1 %v237_v46  ;;  %357 = vmatpush.msra.mxu0 %v220_v48  ;;  %v343_v9 = vld [vmem:[#allocation5 + $0x3f0] sm:$0xff]  ;;  %v310_v11 = vld [vmem:[#allocation5 + $0x2e8] sm:$0xff]  ;;  %v325_v12 = vld [vmem:[#allocation5 + $0x360] sm:$0xff] }
  0x63   : > { %425 = vmatpush.msra.mxu3 %v269_v47  ;;  %403 = vmatpush.msra.mxu2 %v252_v49  ;;  %v342_v13 = vld [vmem:[#allocation5 + $0x3e8] sm:$0xff]  ;;  %v292_v14 = vld [vmem:[#allocation5 + $0x258] sm:$0xff]  ;;  %v309_v15 = vld [vmem:[#allocation5 + $0x2e0] sm:$0xff] }
  0x64   : > { %380 = vmatpush.msra.mxu1 %v236_v50  ;;  %358 = vmatpush.msra.mxu0 %v219_v52  ;;  %v324_v16 = vld [vmem:[#allocation5 + $0x358] sm:$0xff]  ;;  %v341_v17 = vld [vmem:[#allocation5 + $0x3e0] sm:$0xff]  ;;  %v291_v18 = vld [vmem:[#allocation5 + $0x250] sm:$0xff] }
  0x65   : > { %426 = vmatpush.msra.mxu3 %v268_v51  ;;  %404 = vmatpush.msra.mxu2 %v251_v53  ;;  %v308_v19 = vld [vmem:[#allocation5 + $0x2d8] sm:$0xff]  ;;  %v323_v20 = vld [vmem:[#allocation5 + $0x350] sm:$0xff]  ;;  %v290_v22 = vld [vmem:[#allocation5 + $0x248] sm:$0xff] }
  0x66   : > { %381 = vmatpush.msra.mxu1 %v235_v54  ;;  %359 = vmatpush.msra.mxu0 %v218_v56  ;;  %v340_v21 = vld [vmem:[#allocation5 + $0x3d8] sm:$0xff]  ;;  %v307_v23 = vld [vmem:[#allocation5 + $0x2d0] sm:$0xff]  ;;  %v322_v24 = vld [vmem:[#allocation5 + $0x348] sm:$0xff] }
  0x67   : > { %427 = vmatpush.msra.mxu3 %v267_v55  ;;  %405 = vmatpush.msra.mxu2 %v250_v57  ;;  %v339_v25 = vld [vmem:[#allocation5 + $0x3d0] sm:$0xff]  ;;  %v289_v27 = vld [vmem:[#allocation5 + $0x240] sm:$0xff]  ;;  %v306_v28 = vld [vmem:[#allocation5 + $0x2c8] sm:$0xff] }
  0x68   : > { %382 = vmatpush.msra.mxu1 %v234_v58  ;;  %360 = vmatpush.msra.mxu0 %v217_v60  ;;  %v203_v26 = vld [vmem:[%s1027_s17 + $0x10] sm:$0xff]  ;;  %v321_v29 = vld [vmem:[#allocation5 + $0x340] sm:$0xff]  ;;  %v338_v30 = vld [vmem:[#allocation5 + $0x3c8] sm:$0xff] }
  0x69   : > { %428 = vmatpush.msra.mxu3 %v266_v59  ;;  %406 = vmatpush.msra.mxu2 %v249_v61  ;;  %v201_v31 = vld [vmem:[%s1027_s17] sm:$0xff]  ;;  %v204_v32 = vld [vmem:[%s1027_s17 + $0x18] sm:$0xff]  ;;  %v202_v37 = vld [vmem:[%s1027_s17 + $0x8] sm:$0xff] }
  0x6a   : > { %437 = vmatpush.msrb.mxu0 %v296_v62  ;;  %383 = vmatpush.msra.mxu1 %v233_v0  ;;  %v288_v33 = vld [vmem:[#allocation5 + $0x238] sm:$0xff]  ;;  %v305_v34 = vld [vmem:[#allocation5 + $0x2c0] sm:$0xff]  ;;  %v287_v38 = vld [vmem:[#allocation5 + $0x230] sm:$0xff] }
  0x6b   : > { %483 = vmatpush.msrb.mxu2 %v328_v63  ;;  %429 = vmatpush.msra.mxu3 %v265_v1  ;;  %v320_v35 = vld [vmem:[#allocation5 + $0x338] sm:$0xff]  ;;  %v337_v36 = vld [vmem:[#allocation5 + $0x3c0] sm:$0xff]  ;;  %v319_v40 = vld [vmem:[#allocation5 + $0x330] sm:$0xff] }
  0x6c   : > { %438 = vmatpush.msrb.mxu0 %v295_v2  ;;  %460 = vmatpush.msrb.mxu1 %v312_v3  ;;  %v304_v39 = vld [vmem:[#allocation5 + $0x2b8] sm:$0xff]  ;;  %v286_v42 = vld [vmem:[#allocation5 + $0x228] sm:$0xff]  ;;  %v303_v43 = vld [vmem:[#allocation5 + $0x2b0] sm:$0xff] }
  0x6d   : > { %484 = vmatpush.msrb.mxu2 %v327_v4  ;;  %506 = vmatpush.msrb.mxu3 %v344_v5  ;;  %v336_v41 = vld [vmem:[#allocation5 + $0x3b8] sm:$0xff]  ;;  %v318_v44 = vld [vmem:[#allocation5 + $0x328] sm:$0xff]  ;;  %v335_v45 = vld [vmem:[#allocation5 + $0x3b0] sm:$0xff] }
  0x6e   : > { %439 = vmatpush.msrb.mxu0 %v294_v6  ;;  %461 = vmatpush.msrb.mxu1 %v311_v7  ;;  %v211_v46 = vld [vmem:[%s1027_s17 + $0x50] sm:$0xff]  ;;  %v285_v47 = vld [vmem:[#allocation5 + $0x220] sm:$0xff]  ;;  %v302_v48 = vld [vmem:[#allocation5 + $0x2a8] sm:$0xff] }
  0x6f   : > { %485 = vmatpush.msrb.mxu2 %v326_v8  ;;  %507 = vmatpush.msrb.mxu3 %v343_v9  ;;  %v317_v49 = vld [vmem:[#allocation5 + $0x320] sm:$0xff]  ;;  %v334_v50 = vld [vmem:[#allocation5 + $0x3a8] sm:$0xff]  ;;  %v212_v52 = vld [vmem:[%s1027_s17 + $0x58] sm:$0xff] }
  0x70   : > { %440 = vmatpush.msrb.mxu0 %v293_v10  ;;  %462 = vmatpush.msrb.mxu1 %v310_v11  ;;  %v209_v51 = vld [vmem:[%s1027_s17 + $0x40] sm:$0xff]  ;;  %v284_v53 = vld [vmem:[#allocation5 + $0x218] sm:$0xff]  ;;  %v210_v57 = vld [vmem:[%s1027_s17 + $0x48] sm:$0xff] }
  0x71   : > { %486 = vmatpush.msrb.mxu2 %v325_v12  ;;  %508 = vmatpush.msrb.mxu3 %v342_v13  ;;  %v301_v54 = vld [vmem:[#allocation5 + $0x2a0] sm:$0xff]  ;;  %v316_v55 = vld [vmem:[#allocation5 + $0x318] sm:$0xff]  ;;  %v283_v58 = vld [vmem:[#allocation5 + $0x210] sm:$0xff] }
  0x72   : > { %441 = vmatpush.msrb.mxu0 %v292_v14  ;;  %463 = vmatpush.msrb.mxu1 %v309_v15  ;;  %v333_v56 = vld [vmem:[#allocation5 + $0x3a0] sm:$0xff]  ;;  %v300_v59 = vld [vmem:[#allocation5 + $0x298] sm:$0xff]  ;;  %v315_v60 = vld [vmem:[#allocation5 + $0x310] sm:$0xff] }
  0x73   : > { %487 = vmatpush.msrb.mxu2 %v324_v16  ;;  %509 = vmatpush.msrb.mxu3 %v341_v17  ;;  %v332_v61 = vld [vmem:[#allocation5 + $0x398] sm:$0xff]  ;;  %v282_v62 = vld [vmem:[#allocation5 + $0x208] sm:$0xff]  ;;  %v299_v63 = vld [vmem:[#allocation5 + $0x290] sm:$0xff] }
  0x74   : > { %442 = vmatpush.msrb.mxu0 %v291_v18  ;;  %464 = vmatpush.msrb.mxu1 %v308_v19  ;;  %v314_v0 = vld [vmem:[#allocation5 + $0x308] sm:$0xff]  ;;  %v331_v1 = vld [vmem:[#allocation5 + $0x390] sm:$0xff]  ;;  %v281_v2 = vld [vmem:[#allocation5 + $0x200] sm:$0xff] }
  0x75   : > { %488 = vmatpush.msrb.mxu2 %v323_v20  ;;  %510 = vmatpush.msrb.mxu3 %v340_v21  ;;  %v298_v3 = vld [vmem:[#allocation5 + $0x288] sm:$0xff]  ;;  %v313_v4 = vld [vmem:[#allocation5 + $0x300] sm:$0xff]  ;;  %v207_v7 = vld [vmem:[%s1027_s17 + $0x30] sm:$0xff] }
  0x76   : > { %443 = vmatpush.msrb.mxu0 %v290_v22  ;;  %465 = vmatpush.msrb.mxu1 %v307_v23  ;;  %v330_v5 = vld [vmem:[#allocation5 + $0x388] sm:$0xff]  ;;  %v205_v6 = vld [vmem:[%s1027_s17 + $0x20] sm:$0xff]  ;;  %v208_v11 = vld [vmem:[%s1027_s17 + $0x38] sm:$0xff] }
  0x77   : > { %489 = vmatpush.msrb.mxu2 %v322_v24  ;;  %511 = vmatpush.msrb.mxu3 %v339_v25  ;;  %v297_v8 = vld [vmem:[#allocation5 + $0x280] sm:$0xff]  ;;  %v206_v10 = vld [vmem:[%s1027_s17 + $0x28] sm:$0xff]  ;;  %v215_v13 = vld [vmem:[%s1027_s17 + $0x70] sm:$0xff] }
  0x78   : > { %407 = vmatmul.f32.vlgmr.msra.gmra.mxu2 %v203_v26  ;;  %444 = vmatpush.msrb.mxu0 %v289_v27  ;;  %v329_v9 = vld [vmem:[#allocation5 + $0x380] sm:$0xff]  ;;  %v214_v14 = vld [vmem:[%s1027_s17 + $0x68] sm:$0xff]  ;;  %v216_v15 = vld [vmem:[%s1027_s17 + $0x78] sm:$0xff] }
  0x79   : > { %466 = vmatpush.msrb.mxu1 %v306_v28  ;;  %490 = vmatpush.msrb.mxu2 %v321_v29  ;;  %v213_v12 = vld [vmem:[%s1027_s17 + $0x60] sm:$0xff] }
  0x7a   : > { %512 = vmatpush.msrb.mxu3 %v338_v30  ;;  %361 = vmatmul.f32.vlgmr.msra.gmra.mxu0 %v201_v31 }
  0x7b   : > { %430 = vmatmul.f32.vlgmr.msra.gmra.mxu3 %v204_v32  ;;  %445 = vmatpush.msrb.mxu0 %v288_v33 }
  0x7c   : > { %467 = vmatpush.msrb.mxu1 %v305_v34  ;;  %491 = vmatpush.msrb.mxu2 %v320_v35 }
  0x7d   : > { %513 = vmatpush.msrb.mxu3 %v337_v36  ;;  %384 = vmatmul.f32.vlgmr.msra.gmra.mxu1 %v202_v37 }
  0x7e   : > { %446 = vmatpush.msrb.mxu0 %v287_v38  ;;  %468 = vmatpush.msrb.mxu1 %v304_v39 }
  0x7f   : > { %492 = vmatpush.msrb.mxu2 %v319_v40  ;;  %514 = vmatpush.msrb.mxu3 %v336_v41 }
  0x80   : > { %447 = vmatpush.msrb.mxu0 %v286_v42  ;;  %469 = vmatpush.msrb.mxu1 %v303_v43 }
  0x81   : > { %493 = vmatpush.msrb.mxu2 %v318_v44  ;;  %515 = vmatpush.msrb.mxu3 %v335_v45 }
  0x82   : > { %410 = vmatmul.f32.gmra.mxu2 %v211_v46  ;;  %448 = vmatpush.msrb.mxu0 %v285_v47 }
  0x83   : > { %470 = vmatpush.msrb.mxu1 %v302_v48  ;;  %494 = vmatpush.msrb.mxu2 %v317_v49 }
  0x84   : > { %516 = vmatpush.msrb.mxu3 %v334_v50  ;;  %364 = vmatmul.f32.gmra.mxu0 %v209_v51 }
  0x85   : > { %433 = vmatmul.f32.gmra.mxu3 %v212_v52  ;;  %449 = vmatpush.msrb.mxu0 %v284_v53 }
  0x86   : > { %471 = vmatpush.msrb.mxu1 %v301_v54  ;;  %495 = vmatpush.msrb.mxu2 %v316_v55 }
  0x87   : > { %517 = vmatpush.msrb.mxu3 %v333_v56  ;;  %387 = vmatmul.f32.gmra.mxu1 %v210_v57 }
  0x88   : > { %450 = vmatpush.msrb.mxu0 %v283_v58  ;;  %472 = vmatpush.msrb.mxu1 %v300_v59 }
  0x89   : > { %496 = vmatpush.msrb.mxu2 %v315_v60  ;;  %518 = vmatpush.msrb.mxu3 %v332_v61 }
  0x8a   : > { %451 = vmatpush.msrb.mxu0 %v282_v62  ;;  %473 = vmatpush.msrb.mxu1 %v299_v63 }
  0x8b   : > { %497 = vmatpush.msrb.mxu2 %v314_v0  ;;  %519 = vmatpush.msrb.mxu3 %v331_v1 }
  0x8c   : > { %452 = vmatpush.msrb.mxu0 %v281_v2  ;;  %474 = vmatpush.msrb.mxu1 %v298_v3 }
  0x8d   : > { %498 = vmatpush.msrb.mxu2 %v313_v4  ;;  %520 = vmatpush.msrb.mxu3 %v330_v5 }
  0x8e   : > { %453 = vmatmul.f32.vlgmr.msrb.gmra.mxu0 %v205_v6  ;;  %499 = vmatmul.f32.vlgmr.msrb.gmra.mxu2 %v207_v7 }
  0x8f   : > { %475 = vmatpush.msrb.mxu1 %v297_v8  ;;  %521 = vmatpush.msrb.mxu3 %v329_v9 }
  0x90   : > { %476 = vmatmul.f32.vlgmr.msrb.gmra.mxu1 %v206_v10  ;;  %522 = vmatmul.f32.vlgmr.msrb.gmra.mxu3 %v208_v11 }
  0x96   : > { %456 = vmatmul.f32.gmra.mxu0 %v213_v12  ;;  %502 = vmatmul.f32.gmra.mxu2 %v215_v13 }
  0x98   : > { %479 = vmatmul.f32.gmra.mxu1 %v214_v14  ;;  %525 = vmatmul.f32.gmra.mxu3 %v216_v15 }
  0xf7   : > { %v362_v16 = vpop.f32.mrf.mxu0 }
  0xfa   : > { %v385_v17 = vpop.f32.mrf.mxu1 }
  0xfb   : > { %v408_v18 = vpop.f32.mrf.mxu2  ;;  %v386_v21 = vadd.f32 %v385_v17, %v362_v16 }
  0xfd   : > { %v409_v23 = vadd.f32 %v408_v18, %v386_v21 }
  0xfe   : > { %v431_v19 = vpop.f32.mrf.mxu3 }
  0xff   : > { %v432_v25 = vadd.f32 %v431_v19, %v409_v23 }
 0x101   : > { %v365_v20 = vpop.f32.mrf.mxu0 }
 0x104   : > { %v388_v22 = vpop.f32.mrf.mxu1 }
 0x105   : > { %v411_v24 = vpop.f32.mrf.mxu2  ;;  %v389_v26 = vadd.f32 %v388_v22, %v365_v20 }
 0x107   : > { %v412_v31 = vadd.f32 %v411_v24, %v389_v26 }
 0x108   : > { %v434_v27 = vpop.f32.mrf.mxu3 }
 0x109   : > { %v435_v34 = vadd.f32 %v434_v27, %v412_v31 }
 0x10b   : > { %v454_v28 = vpop.f32.mrf.mxu0 }
 0x10c   : > { %v455_v29 = vadd.f32 %v454_v28, %v432_v25 }
 0x10d   : > { %v477_v30 = vpop.f32.mrf.mxu1 }
 0x10e   : > { %v478_v32 = vadd.f32 %v477_v30, %v455_v29 }
 0x111   : > { %v500_v33 = vpop.f32.mrf.mxu2 }
 0x112   : > { %v501_v35 = vadd.f32 %v500_v33, %v478_v32 }
 0x113   : > { %v457_v36 = vpop.f32.mrf.mxu0  ;;  %v523_v37 = vpop.f32.mrf.mxu3 }
 0x114   : > { %v458_v38 = vadd.f32 %v457_v36, %v435_v34  ;;  %v524_v39 = vadd.f32 %v523_v37, %v501_v35 }
 0x115   : > { %v480_v40 = vpop.f32.mrf.mxu1 }
 0x116   : > { %529 = vst [vmem:[%s189_s23] sm:$0xff] %v524_v39  ;;  %v481_v41 = vadd.f32 %v480_v40, %v458_v38 }
 0x119   : > { %v503_v42 = vpop.f32.mrf.mxu2 }
 0x11a   : > { %v504_v43 = vadd.f32 %v503_v42, %v481_v41  ;;  %538 = sbr.rel (!%p951_p11) target bundleno = 318 (0x13e), region = 40 }
 0x11b   : > { %v526_v44 = vpop.f32.mrf.mxu3 }
 0x11c   : > { %v527_v45 = vadd.f32 %v526_v44, %v504_v43 }
 0x11e   : > { %530 = vst [vmem:[%s189_s23 + $0x8] sm:$0xff] %v527_v45 }
 0x11f   : > { %s1139_s19 = smov (!%p541_p6, %s540_s19), 2 }
 0x120   : > { %s656_s28 = sshll.u32 %s1139_s19, 3 }
 0x121   : > { %s544_s29 = ssub.s32 16, %s656_s28 }
 0x122   : > { %s545_s30 = sshll.u32 %s544_s29, 4 }
 0x123   : > { %546 = vsyncadd %s532_s6, %s545_s30  ;;  %p1063_p13 = scmp.ne.s32.totalorder %s656_s28, 0  ;;  %s666_s21 = sshll.u32 %s920_s13, 4 }
 0x124   : > { %s549_s27 = scalar_lea.hbm %s1118_s2, %s666_s21  ;;  %s551_s7 = sshll.u32 %s189_s23, 4  ;;  %s1071_s7 = int_to_ptr.vmem [resolvable:$true] %s551_s7 }
 0x125   : > { %s553_s3 = sshll.u32 %s549_s27, 4  ;;  %s660_s5 = sshll.u32 %s1139_s19, 7  ;;  %s1073_s3 = int_to_ptr.hbm [resolvable:$true] %s553_s3 }
 0x126   : > { %s792_s8 = sshra.s32 %s1071_s7, 4  ;;  %s794_s14 = sshrl.u32 %s660_s5, 4  ;;  %s793_s8 = int_to_ptr.vmem [resolvable:$true] %s792_s8 }
 0x127   : > { %s799_s17 = scalar_lea.vmem %s793_s8, %s794_s14  ;;  %s881_s13 = smov [#allocation7]  }
 0x128   : > { %p800_p11 = scmp.ne.s32.totalorder %s793_s8, %s799_s17  ;;  %s803_s20 = scalar_lea.vmem %s881_s13, 32 }
 0x129   : > { %p805_p9 = scmp.lt.s32.totalorder %s803_s20, %s799_s17 }
 0x12a   : > { %p801_p2 = pnand %p800_p11, %p1063_p13 }
 0x12c   : > { %p802_p5 = pneg %p801_p2 }
 0x12e   : > { %p807_p10 = pnand %p805_p9, %p802_p5 }
 0x130   : > { %810 = shalt.err (!%p807_p10)
}
 0x131   : > { %s811_s23 = sshra.s32 %s1073_s3, 4  ;;  %s822_s30 = scalar_lea.hbm %s1118_s2, 24  ;;  %s812_s23 = int_to_ptr.hbm [resolvable:$true] %s811_s23 }
 0x132   : > { %s818_s16 = scalar_lea.hbm %s812_s23, %s794_s14  ;;  %p823_p7 = scmp.lt.s32.totalorder %s812_s23, %s1118_s2 }
 0x133   : > { %p819_p1 = scmp.ne.s32.totalorder %s812_s23, %s818_s16  ;;  %p824_p8 = scmp.lt.s32.totalorder %s822_s30, %s818_s16 }
 0x135   : > { %p820_p0 = pnand %p819_p1, %p1063_p13  ;;  %p825_p4 = por %p824_p8, %p823_p7 }
 0x137   : > { %p821_p3 = pneg %p820_p0 }
 0x139   : > { %p826_p12 = pnand %p825_p4, %p821_p3 }
 0x13b   : > { %829 = shalt.err (!%p826_p12)
}
 0x13c   : > { %s882_s26 = smov 128   ;;  %s883_s27 = smov 8  }
 0x13d   : > { %559 = dma.vmem_to_hbm [thread:$0]  (%p1063_p13), %s1071_s7, %s660_s5, %s1073_s3, %s532_s6, %s882_s26, %s882_s26, %s883_s27  }
 0x13e PF: > { %s568_s8 = sand.u32 1, %s861_s9   ;;  %p1130_p6 = scmp.ne.s32.totalorder %s1124_s22, 0 }
 0x13f   : > { %p1131_p11 = scmp.ge.s32.totalorder %s873_s12, 2  ;;  %s569_s14 = scalar_lea.sflag [#allocation4], %s568_s8 }
 0x141   : > { %p678_p2 = pnand %p1131_p11, %p1130_p6 }
 0x143   : > { %p679_p5 = pneg %p678_p2 }
 0x145   : > { %856 = dma.done.wait (%p679_p5), %s569_s14, 256  }
 0x146   : > { %858 = vsyncadd (%p679_p5), %s569_s14, 4294967040  ;;  %p16_p9 = scmp.ge.s32.totalorder %s924_s15, 4   ;;  %s1132_s9 = smov %s865_s10 }
 0x147   : > { %s1133_s10 = smov %s869_s11  ;;  %s1134_s11 = smov %s936_s18 }
 0x148   : > { %s1135_s12 = smov %s924_s15  ;;  %18 = sbr.rel (!%p16_p9) target bundleno = 6 (0x6), region = 77 }
 0x14d   :  { %575 = vsyncpa [#allocation3], 1 }
 0x14e   :  { %577 = vsyncpa [#allocation3 + $0x1], 1 }
 0x14f   :  { %578 = vsyncpa [#allocation6], 1 }
 0x150   :  { %579 = vsyncpa [#allocation4], 1 }
 0x151   :  { %581 = vsyncpa [#allocation4 + $0x1], 1 }

</bundles_post_ra>
